<compile_context>
chip_gen: v7x
topology: tpu7x:2x2x1
jax: 0.10.0
libtpu: 0.0.40
codegen_flags: <defaults>
</compile_context>

<pallas_src>
import jax
import jax.numpy as jnp
from jax.experimental import pallas as pl
from jax.experimental.pallas import tpu as pltpu


def _time_weighted_sum_kernel(x_ref, w_ref, o_ref):
    # x_ref: (TB, T, TD) native-dtype tile; w_ref: (T, 1) f32; o_ref: (TB, TD) f32
    x = x_ref[...].astype(jnp.float32)          # in-kernel upcast (free under DMA)
    w = w_ref[...]                              # (T, 1)
    o_ref[...] = jnp.sum(x * w[None, :, :], axis=1).astype(o_ref.dtype)


def _largest_divisor_multiple(dim, align, cap):
    """Largest multiple of `align` that divides `dim` and is <= cap, else None."""
    if dim % align != 0:
        return None
    best = None
    limit = min(dim, cap)
    for cand in range(align, limit + 1, align):
        if dim % cand == 0:
            best = cand
    return best


def _pick_blocks(B, T, D, itemsize, vmem_budget_bytes=4 * 1024 * 1024):
    # Lane axis: 512-wide lane-dense tiles when D is large, full D otherwise.
    td = _largest_divisor_multiple(D, 128, 512) or D
    # Batch tile: multiple of 8, sized so one x block stays within ~4 MiB
    # (x double-buffer + out block + weights then fit any generation's VMEM).
    tb_cap = max(8, vmem_budget_bytes // max(1, T * td * itemsize))
    tb = _largest_divisor_multiple(B, 8, tb_cap) or B
    return tb, td


def time_weighted_sum(x: jax.Array, weights: jax.Array) -> jax.Array:
    """x: (B, T, D) any float dtype; weights: (T,) -> (B, D) float32."""
    B, T, D = x.shape
    w2d = weights.reshape(T, 1).astype(jnp.float32)
    tb, td = _pick_blocks(B, T, D, jnp.dtype(x.dtype).itemsize)
    grid = (B // tb, D // td)

    return pl.pallas_call(
        _time_weighted_sum_kernel,
        out_shape=jax.ShapeDtypeStruct((B, D), jnp.float32),
        grid=grid,
        in_specs=[
            pl.BlockSpec((tb, T, td), lambda i, j: (i, 0, j)),
            pl.BlockSpec((T, 1), lambda i, j: (0, 0)),
        ],
        out_specs=pl.BlockSpec((tb, td), lambda i, j: (i, j)),
        compiler_params=pltpu.CompilerParams(
            dimension_semantics=("parallel", "parallel")
        ),
    )(x, w2d)  # x streamed in native dtype; upcast happens in-kernel


if __name__ == "__main__":
    key = jax.random.PRNGKey(0)
    k1, k2 = jax.random.split(key)

    # --- Toy module config (time_window = T), f32 input -------------------
    B, T, D = 2, 8, 32
    weights = jnp.linspace(1.0, 0.0, num=T, dtype=jnp.float32)
    x = jax.random.normal(k1, (B, T, D), dtype=jnp.float32)

    out = jax.block_until_ready(time_weighted_sum(x, weights))
    ref = jnp.sum(x * weights[None, :, None], axis=1)
    assert out.shape == (B, D)
    assert jnp.allclose(out, ref, atol=1e-5, rtol=1e-5), "f32 mismatch vs reference"

    # --- Larger bf16 case: exercises the tiled (parallel x parallel) grid,
    #     lane-dense 512-wide D tiles and in-kernel upcast/f32 accumulation --
    B2, T2, D2 = 16, 8, 1024
    w2 = jnp.linspace(1.0, 0.0, num=T2, dtype=jnp.float32)
    x2 = jax.random.normal(k2, (B2, T2, D2), dtype=jnp.float32).astype(jnp.bfloat16)

    out2 = jax.block_until_ready(time_weighted_sum(x2, w2))
    ref2 = jnp.sum(x2.astype(jnp.float32) * w2[None, :, None], axis=1)
    assert out2.shape == (B2, D2)
    assert jnp.allclose(out2, ref2, atol=1e-3, rtol=1e-3), "bf16 mismatch vs reference"

    print("KERNEL_OK")
</pallas_src>

<mosaic_0001>
module attributes {stable_mosaic.version = 11 : i64} {
  func.func @_time_weighted_sum_kernel(%arg0: i32, %arg1: i32, %arg2: memref<2x8x32xf32, #tpu.memory_space<vmem>>, %arg3: memref<8x1xf32, #tpu.memory_space<vmem>>, %arg4: memref<2x32xf32, #tpu.memory_space<vmem>>) attributes {dimension_semantics = [#tpu.dimension_semantics<parallel>, #tpu.dimension_semantics<parallel>], iteration_bounds = array<i64: 1, 1>, scalar_prefetch = 0 : i64, scratch_operands = 0 : i64, tpu.core_type = #tpu.core_type<tc>, window_params = [{transform_indices = @transform_0, window_bounds = array<i64: 2, 8, 32>}, {pipeline_mode = #tpu.pipeline_mode<synchronous>, transform_indices = @transform_1, window_bounds = array<i64: 8, 1>}, {transform_indices = @transform_2, window_bounds = array<i64: 2, 32>}]} {
    %c0 = arith.constant 0 : index
    %c0_0 = arith.constant 0 : index
    %c0_1 = arith.constant 0 : index
    %0 = vector.load %arg2[%c0, %c0_0, %c0_1] : memref<2x8x32xf32, #tpu.memory_space<vmem>>, vector<2x8x32xf32>
    %c0_2 = arith.constant 0 : index
    %c0_3 = arith.constant 0 : index
    %1 = vector.load %arg3[%c0_2, %c0_3] : memref<8x1xf32, #tpu.memory_space<vmem>>, vector<8x1xf32>
    %2 = vector.shape_cast %1 : vector<8x1xf32> to vector<1x8x1xf32>
    %3 = vector.broadcast %2 : vector<1x8x1xf32> to vector<2x8x32xf32>
    %4 = arith.mulf %0, %3 : vector<2x8x32xf32>
    %cst = arith.constant dense<0.000000e+00> : vector<2x32xf32>
    %5 = vector.multi_reduction <add>, %4, %cst [1] : vector<2x8x32xf32> to vector<2x32xf32>
    %c0_4 = arith.constant 0 : index
    %c0_5 = arith.constant 0 : index
    %6 = vector.load %arg4[%c0_4, %c0_5] : memref<2x32xf32, #tpu.memory_space<vmem>>, vector<2x32xf32>
    tpu.vector_store %arg4[%c0_4, %c0_5], %5 {strides = array<i32>} : memref<2x32xf32, #tpu.memory_space<vmem>>, vector<2x32xf32>,
    return
  }
  func.func @transform_0(%arg0: i32, %arg1: i32) -> (i32, i32, i32) {
    %c0_i32 = arith.constant 0 : i32
    %c0_i32_0 = arith.constant 0 : i32
    return %arg0, %c0_i32, %arg1 : i32, i32, i32
  }
  func.func @transform_1(%arg0: i32, %arg1: i32) -> (i32, i32) {
    %c0_i32 = arith.constant 0 : i32
    %c0_i32_0 = arith.constant 0 : i32
    %c0_i32_1 = arith.constant 0 : i32
    return %c0_i32, %c0_i32_0 : i32, i32
  }
  func.func @transform_2(%arg0: i32, %arg1: i32) -> (i32, i32) {
    %c0_i32 = arith.constant 0 : i32
    return %arg0, %arg1 : i32, i32
  }
}

</mosaic_0001>

<bundles_post_ra>
// kernel: tpu_custom_call.1
= control target key start
LH: loop header
LB: loop body
LE: loop exit
PB: predicated region body
PF: predicated region fallthrough
CT: control target
= control target key end

     0   :  { %7 = vsyncpa [#allocation3], 0  ;;  %s174_s0 = inlined_call_operand.hbm [shape: f32[2,8,32], index: 0, kind: input, shape index: {}]   ;;  %s175_s1 = inlined_call_operand.vmem [shape: f32[8,1], index: 1, kind: input, shape index: {}]   ;;  %s176_s2 = inlined_call_operand.hbm [shape: f32[2,32], index: 2, kind: output, shape index: {}]  }
   0x1   :  { %8 = vsyncpa [#allocation4], 0  ;;  %s127_s9 = smov [#allocation2]   ;;  %s79_s13 = scalar_lea.hbm %s174_s0, 256 }
   0x2   :  { %s14_s10 = sshll.u32 %s127_s9, 4  ;;  %p80_p0 = scmp.ne.s32.totalorder %s174_s0, %s79_s13  ;;  %s15_s10 = int_to_ptr.vmem [resolvable:$true] %s14_s10 }
   0x3   :  { %p83_p1 = scmp.lt.u32.totalorder %s79_s13, %s174_s0 }
   0x5   :  { %p85_p2 = pnand %p83_p1, %p80_p0 }
   0x7   :  { %88 = shalt.err (!%p85_p2)
}
   0x8   :  { %s89_s18 = scalar_lea.vmem %s15_s10, 256  ;;  %p94_p4 = scmp.lt.s32.totalorder %s15_s10, %s15_s10 }
   0x9   :  { %p90_p3 = scmp.ne.s32.totalorder %s15_s10, %s89_s18  ;;  %p95_p5 = scmp.lt.s32.totalorder %s89_s18, %s89_s18 }
   0xb   :  { %p96_p6 = por %p95_p5, %p94_p4 }
   0xd   :  { %p97_p7 = pnand %p96_p6, %p90_p3 }
   0xf   :  { %100 = shalt.err (!%p97_p7)
}
  0x10   :  { %s128_s19 = smov 128   ;;  %s129_s20 = smov 8  }
  0x11   :  { %20 = dma.hbm_to_vmem [thread:$0]  %s174_s0, 256, %s15_s10, [#allocation3], %s128_s19, %s128_s19, %s129_s20  }
  0x12   :  { %123 = dma.done.wait [#allocation3], 256  }
  0x13   :  { %124 = vsyncadd [#allocation3], 4294967040  ;;  %v130_v0 = vmov 0   ;;  %v28_v1 = vld [vmem:[%s175_s1] sm:$0xff]  ;;  %v27_v3 = vld [vmem:[#allocation2 + $0x8] sm:$0xff]  ;;  %vm36_vm0 = vcmask 261120  }
  0x14   :  { %78 = vset.pattern.permute.xlu0 %v130_v0  ;;  %v26_v2 = vld [vmem:[#allocation2] sm:$0xff]  ;;  %s131_s0 = smov [#allocation5]   ;;  %vm53_vm1 = vcmask 1041409   ;;  %vm56_vm2 = vcmask 254976  }
  0x15   :  { %31 = vperm.xlu0 %78, %v28_v1   ;;  %s64_s1 = sshll.u32 %s131_s0, 4  ;;  %s65_s1 = int_to_ptr.vmem [resolvable:$true] %s64_s1 }
  0x16   :  { %s101_s25 = scalar_lea.vmem %s65_s1, 32  ;;  %p106_p9 = scmp.lt.s32.totalorder %s65_s1, %s65_s1 }
  0x17   :  { %p102_p8 = scmp.ne.s32.totalorder %s65_s1, %s101_s25  ;;  %p107_p10 = scmp.lt.s32.totalorder %s101_s25, %s101_s25 }
  0x19   :  { %p108_p11 = por %p107_p10, %p106_p9 }
  0x1b   :  { %p109_p12 = pnand %p108_p11, %p102_p8 }
  0x94   :  { %v32_v4 = vpop.permute.xlu0 %31 }
  0x95   :  { %v34_v5 = vmul.f32 %v32_v4, %v26_v2  ;;  %v35_v6 = vmul.f32 %v32_v4, %v27_v3 }
  0x97   :  { %v37_v7 = vsel %vm36_vm0, %v34_v5, 0.0  ;;  %v44_v8 = vsel %vm36_vm0, %v35_v6, 0.0 }
  0x98   :  { %v38_v9 = vrot.slane %v37_v7, 4  ;;  %v45_v10 = vrot.slane %v44_v8, 4 }
  0x9a   :  { %v39_v11 = vadd.f32 %v38_v9, %v37_v7  ;;  %v46_v12 = vadd.f32 %v45_v10, %v44_v8 }
  0x9c   :  { %v40_v13 = vrot.slane %v39_v11, 2  ;;  %v47_v14 = vrot.slane %v46_v12, 2 }
  0x9e   :  { %v41_v15 = vadd.f32 %v40_v13, %v39_v11  ;;  %v48_v16 = vadd.f32 %v47_v14, %v46_v12 }
  0xa0   :  { %v42_v17 = vrot.slane %v41_v15, 1  ;;  %v49_v18 = vrot.slane %v48_v16, 1 }
  0xa2   :  { %v43_v19 = vadd.f32 %v42_v17, %v41_v15  ;;  %v50_v20 = vadd.f32 %v49_v18, %v48_v16 }
  0xa4   :  { %v54_v21 = vsel %vm53_vm1, %v50_v20, %v43_v19 }
  0xa5   :  { %57 = vst.msk [vmem:[#allocation5] sm:$0x3] %vm56_vm2, %v54_v21 }
  0xa6   :  { %112 = shalt.err (!%p109_p12)
}
  0xa7   :  { %s113_s28 = scalar_lea.hbm %s176_s2, 32 }
  0xa8   :  { %p114_p13 = scmp.ne.s32.totalorder %s176_s2, %s113_s28  ;;  %p117_p0 = scmp.lt.u32.totalorder %s113_s28, %s176_s2 }
  0xaa   :  { %p119_p1 = pnand %p117_p0, %p114_p13 }
  0xac   :  { %122 = shalt.err (!%p119_p1)
}
  0xad   :  { %67 = dma.vmem_to_hbm [thread:$0]  %s65_s1, 32, %s176_s2, [#allocation4]  }
  0xae   :  { %125 = dma.done.wait [#allocation4], 32  }
  0xaf   :  { %126 = vsyncadd [#allocation4], 4294967264 }
  0xb0   :  { %71 = vsyncpa [#allocation3], 1 }
  0xb1   :  { %72 = vsyncpa [#allocation4], 1 }

</bundles_post_ra>
